<compile_context>
chip_gen: v7x
topology: tpu7x:2x2x1
jax: 0.10.0
libtpu: 0.0.40
codegen_flags: <defaults>
</compile_context>

<pallas_src>
import functools
import math

import jax
import jax.numpy as jnp
from jax import lax
from jax.experimental import pallas as pl
from jax.experimental.pallas import tpu as pltpu


def _round_up(x, m):
    return ((x + m - 1) // m) * m


def _sublane(dtype):
    # Native sublane packing: 8 rows for f32, 16 for bf16/f16, 32 for int8/fp8.
    return max(8, 32 // jnp.dtype(dtype).itemsize)


def _vmem_capacity_bytes():
    try:
        return int(pltpu.get_tpu_info().vmem_capacity_bytes)
    except Exception:
        return 64 * 1024 * 1024  # conservative fallback, valid on every gen


def ffn_kernel(x_ref, w1_ref, b1_ref, w2_ref, b2_ref, o_ref, acc_ref, *,
               gelu_activation, mxu_dtype):
    # x_ref:  (tm, K)     w1_ref: (K, tH)   b1_ref: (1, tH)
    # w2_ref: (tH, N)     b2_ref: (1, N)    o_ref:  (tm, N)   acc_ref: (tm, N) f32
    h_step = pl.program_id(1)

    @pl.when(h_step == 0)
    def _init():
        # Fold the second bias into the accumulator init (one less VPU pass).
        acc_ref[...] = jnp.broadcast_to(
            b2_ref[...].astype(jnp.float32), acc_ref.shape)

    x = x_ref[...]
    w1 = w1_ref[...]
    if mxu_dtype is not None:          # bf16 MXU fast path (v6e/v7x)
        x = x.astype(mxu_dtype)
        w1 = w1.astype(mxu_dtype)
    t = jnp.dot(x, w1, preferred_element_type=jnp.float32)
    t = t + b1_ref[...].astype(jnp.float32)        # per-chunk bias, f32

    if gelu_activation:
        # exact erf-GELU, in f32 (v5e has no bf16 VPU/EUP)
        t = 0.5 * t * (1.0 + lax.erf(t * (1.0 / math.sqrt(2.0))))
    else:
        t = jnp.maximum(t, 0.0)

    w2 = w2_ref[...]
    second_dtype = mxu_dtype if mxu_dtype is not None else w2.dtype
    if mxu_dtype is not None:
        w2 = w2.astype(mxu_dtype)
    acc_ref[...] += jnp.dot(t.astype(second_dtype), w2,
                            preferred_element_type=jnp.float32)

    @pl.when(h_step == pl.num_programs(1) - 1)
    def _store():
        o_ref[...] = acc_ref[...].astype(o_ref.dtype)


def transformer_ffn(x, w1, b1, w2, b2, *, gelu_activation=True, dropout=0.0,
                    training=False, tm=256, th=512, mxu_bf16=False):
    """x: (seq_len, batch, in_dim) -> (seq_len, batch, out_dim).

    w1: (in_dim, hidden), b1: (hidden,), w2: (hidden, out_dim), b2: (out_dim,).
    Dropout is identity (eval mode).  mxu_bf16=True casts f32 operands to bf16
    for the MXU (f32 accumulation) -- faster on v6e/v7x, slightly looser numerics.
    """
    del dropout  # identity in eval mode
    if training:
        raise NotImplementedError("training-mode dropout not implemented")
    seq_len, batch, in_dim = x.shape
    hidden = w1.shape[1]
    out_dim = w2.shape[1]
    dtype = x.dtype
    itemsize = jnp.dtype(dtype).itemsize

    M = seq_len * batch
    sub = _sublane(dtype)

    # Lane / MXU alignment: pad feature dims to multiples of 128.
    K_pad = _round_up(in_dim, 128)
    N_pad = _round_up(out_dim, 128)

    # --- row tile: big to feed the MXU, but guarantee >=2 grid steps along M
    # (v7x has 2 TensorCores) whenever M is large enough to split.
    tm_eff = min(_round_up(tm, sub), _round_up(M, sub))
    if pl.cdiv(M, tm_eff) < 2 and M > sub:
        tm_eff = _round_up(pl.cdiv(M, 2), sub)

    # --- hidden-dim chunk tile (multiple of 128, capped to the padded hidden).
    tH_eff = min(_round_up(th, 128), _round_up(hidden, 128))

    vmem_cap = _vmem_capacity_bytes()

    def footprint(tm_e, th_e):
        return (2 * tm_e * K_pad * itemsize        # x tile (double-buffered over M)
                + 2 * K_pad * th_e * itemsize      # w1 chunk (double-buffered over H)
                + 2 * th_e * itemsize              # b1 chunk
                + 2 * th_e * N_pad * itemsize      # w2 chunk
                + 2 * N_pad * itemsize             # b2
                + 2 * tm_e * N_pad * itemsize      # out tile
                + tm_e * N_pad * 4                 # f32 accumulator scratch
                + tm_e * th_e * 4)                 # live f32 intermediate (estimate)

    # Auto-shrink tiles if the estimated footprint would not fit the budget.
    while tH_eff > 128 and footprint(tm_eff, tH_eff) > int(0.6 * vmem_cap):
        tH_eff = max(128, tH_eff // 2)
    while tm_eff > sub and footprint(tm_eff, tH_eff) > int(0.6 * vmem_cap):
        tm_eff = max(sub, _round_up(tm_eff // 2, sub))

    H_pad = _round_up(hidden, tH_eff)
    num_m = pl.cdiv(M, tm_eff)      # partial last M tile is masked by Pallas
    num_h = H_pad // tH_eff

    # --- host-side padding: feature dims only (no-ops for 128-multiple dims).
    # The x K-pad is load-bearing: zero-fill of the contraction dim guarantees
    # padded columns contribute exactly 0 (garbage * 0 would be NaN).
    x2 = x.reshape(M, in_dim)
    if K_pad != in_dim:
        x2 = jnp.pad(x2, ((0, 0), (0, K_pad - in_dim)))
    w1p = jnp.pad(w1, ((0, K_pad - in_dim), (0, H_pad - hidden)))
    b1p = jnp.pad(b1.reshape(1, hidden), ((0, 0), (0, H_pad - hidden)))
    w2p = jnp.pad(w2, ((0, H_pad - hidden), (0, N_pad - out_dim)))
    b2p = jnp.pad(b2.reshape(1, out_dim), ((0, 0), (0, N_pad - out_dim)))

    mxu_dtype = jnp.bfloat16 if (mxu_bf16 and dtype == jnp.float32) else None
    kernel = functools.partial(ffn_kernel, gelu_activation=gelu_activation,
                               mxu_dtype=mxu_dtype)

    # Generation-aware VMEM limit: ~85% of physical (leave headroom for Mosaic
    # internal scratch), floored at 32 MiB.
    vmem_limit = int(min(max(int(footprint(tm_eff, tH_eff) * 1.5),
                             32 * 1024 * 1024),
                         int(0.85 * vmem_cap)))

    cost = pl.CostEstimate(
        flops=2 * M * (K_pad * H_pad + H_pad * N_pad),
        transcendentals=(M * H_pad) if gelu_activation else 0,
        bytes_accessed=(M * (K_pad + N_pad) * itemsize
                        + num_m * (K_pad * H_pad + H_pad * N_pad) * itemsize
                        + (H_pad + N_pad) * itemsize),
    )

    out2 = pl.pallas_call(
        kernel,
        out_shape=jax.ShapeDtypeStruct((M, N_pad), dtype),
        grid_spec=pltpu.PrefetchScalarGridSpec(
            num_scalar_prefetch=0,
            grid=(num_m, num_h),
            in_specs=[
                # x tile: block index constant across the inner h axis -> the
                # pipeline re-uses the buffer instead of re-DMAing each h step.
                pl.BlockSpec((tm_eff, K_pad), lambda i, h: (i, 0)),
                # weight / bias chunks change every h step -> default (double)
                # buffering so the next chunk's DMA overlaps the MXU.
                pl.BlockSpec((K_pad, tH_eff), lambda i, h: (0, h)),
                pl.BlockSpec((1, tH_eff), lambda i, h: (0, h)),
                pl.BlockSpec((tH_eff, N_pad), lambda i, h: (h, 0)),
                pl.BlockSpec((1, N_pad), lambda i, h: (0, 0)),
            ],
            out_specs=pl.BlockSpec((tm_eff, N_pad), lambda i, h: (i, 0)),
            scratch_shapes=[pltpu.VMEM((tm_eff, N_pad), jnp.float32)],
        ),
        compiler_params=pltpu.CompilerParams(
            dimension_semantics=("parallel", "arbitrary"),
            vmem_limit_bytes=vmem_limit,
        ),
        cost_estimate=cost,
    )(x2, w1p, b1p, w2p, b2p)

    return out2[:, :out_dim].reshape(seq_len, batch, out_dim)


def init_linear_params(key, in_features, out_features, dtype=jnp.float32):
    """Matches torch.nn.Linear default init: U(-1/sqrt(in), 1/sqrt(in)).
    Returns (weight_T, bias) with weight_T shaped (in_features, out_features)."""
    kw, kb = jax.random.split(key)
    bound = 1.0 / math.sqrt(in_features)
    w_t = jax.random.uniform(kw, (in_features, out_features), dtype,
                             minval=-bound, maxval=bound)
    b = jax.random.uniform(kb, (out_features,), dtype,
                           minval=-bound, maxval=bound)
    return w_t, b


def reference_ffn(x, w1, b1, w2, b2, gelu_activation=True):
    h = jnp.dot(x, w1) + b1
    if gelu_activation:
        h = 0.5 * h * (1.0 + lax.erf(h / math.sqrt(2.0)))
    else:
        h = jnp.maximum(h, 0.0)
    return jnp.dot(h, w2) + b2  # dropout is identity in eval mode


if __name__ == "__main__":
    key = jax.random.PRNGKey(0)
    kx, k1, k2, kx2, k3, k4 = jax.random.split(key, 6)

    # Case 1: small FFN (seq=8, batch=2, in=32, hidden=128, out=32), GELU, f32.
    seq_len, batch = 8, 2
    in_dim, dim_hidden, out_dim = 32, 128, 32
    x = jax.random.normal(kx, (seq_len, batch, in_dim), dtype=jnp.float32)
    w1, b1 = init_linear_params(k1, in_dim, dim_hidden)
    w2, b2 = init_linear_params(k2, dim_hidden, out_dim)

    out = jax.block_until_ready(
        transformer_ffn(x, w1, b1, w2, b2, gelu_activation=True))
    ref = reference_ffn(x, w1, b1, w2, b2, gelu_activation=True)
    assert out.shape == (seq_len, batch, out_dim)
    assert jnp.allclose(out, ref, atol=1e-5, rtol=1e-5), "GELU case mismatch"

    # Case 2: ragged row count (7*3=21 -> partial last M tile, no row padding)
    # + H-chunked reduction (hidden=384, th=128 -> 3 H steps) + ReLU.
    in2, hid2, od2 = 64, 384, 96
    x2 = jax.random.normal(kx2, (7, 3, in2), dtype=jnp.float32)
    w1b, b1b = init_linear_params(k3, in2, hid2)
    w2b, b2b = init_linear_params(k4, hid2, od2)
    out2 = jax.block_until_ready(
        transformer_ffn(x2, w1b, b1b, w2b, b2b, gelu_activation=False, th=128))
    ref2 = reference_ffn(x2, w1b, b1b, w2b, b2b, gelu_activation=False)
    assert out2.shape == (7, 3, od2)
    assert jnp.allclose(out2, ref2, atol=1e-4, rtol=1e-4), "ReLU case mismatch"

    # Case 3: bf16 MXU operands (v6e/v7x fast path), f32 accumulation.
    out3 = jax.block_until_ready(
        transformer_ffn(x, w1, b1, w2, b2, gelu_activation=True, mxu_bf16=True))
    assert jnp.allclose(out3, ref, atol=5e-2, rtol=5e-2), "bf16 MXU mismatch"

    print("KERNEL_OK")
</pallas_src>

<mosaic_0001>
module attributes {stable_mosaic.version = 11 : i64} {
  func.func @ffn_kernel(%arg0: i32, %arg1: i32, %arg2: memref<8x128xf32, #tpu.memory_space<vmem>>, %arg3: memref<128x128xf32, #tpu.memory_space<vmem>>, %arg4: memref<1x128xf32, #tpu.memory_space<vmem>>, %arg5: memref<128x128xf32, #tpu.memory_space<vmem>>, %arg6: memref<1x128xf32, #tpu.memory_space<vmem>>, %arg7: memref<8x128xf32, #tpu.memory_space<vmem>>, %arg8: memref<8x128xf32, #tpu.memory_space<vmem>>) attributes {dimension_semantics = [#tpu.dimension_semantics<parallel>, #tpu.dimension_semantics<arbitrary>], iteration_bounds = array<i64: 2, 1>, scalar_prefetch = 0 : i64, scratch_operands = 1 : i64, tpu.core_type = #tpu.core_type<tc>, window_params = [{transform_indices = @transform_0, window_bounds = array<i64: 8, 128>}, {transform_indices = @transform_1, window_bounds = array<i64: 128, 128>}, {transform_indices = @transform_2, window_bounds = array<i64: 1, 128>}, {transform_indices = @transform_3, window_bounds = array<i64: 128, 128>}, {pipeline_mode = #tpu.pipeline_mode<synchronous>, transform_indices = @transform_4, window_bounds = array<i64: 1, 128>}, {transform_indices = @transform_5, window_bounds = array<i64: 8, 128>}]} {
    %c0_i32 = arith.constant 0 : i32
    %0 = arith.cmpi eq, %arg1, %c0_i32 : i32
    %1 = arith.extui %0 : i1 to i32
    %c0_i32_0 = arith.constant 0 : i32
    %2 = arith.cmpi ne, %1, %c0_i32_0 : i32
    scf.if %2 {
      %c0_18 = arith.constant 0 : index
      %c0_19 = arith.constant 0 : index
      %25 = vector.load %arg6[%c0_18, %c0_19] : memref<1x128xf32, #tpu.memory_space<vmem>>, vector<1x128xf32>
      %26 = vector.shape_cast %25 : vector<1x128xf32> to vector<1x128xf32>
      %27 = vector.broadcast %26 : vector<1x128xf32> to vector<8x128xf32>
      %c0_20 = arith.constant 0 : index
      %c0_21 = arith.constant 0 : index
      %28 = vector.load %arg8[%c0_20, %c0_21] : memref<8x128xf32, #tpu.memory_space<vmem>>, vector<8x128xf32>
      tpu.vector_store %arg8[%c0_20, %c0_21], %27 {strides = array<i32>} : memref<8x128xf32, #tpu.memory_space<vmem>>, vector<8x128xf32>,
    } else {
    }
    %c0 = arith.constant 0 : index
    %c0_1 = arith.constant 0 : index
    %3 = vector.load %arg2[%c0, %c0_1] : memref<8x128xf32, #tpu.memory_space<vmem>>, vector<8x128xf32>
    %c0_2 = arith.constant 0 : index
    %c0_3 = arith.constant 0 : index
    %4 = vector.load %arg3[%c0_2, %c0_3] : memref<128x128xf32, #tpu.memory_space<vmem>>, vector<128x128xf32>
    %cst = arith.constant dense<0.000000e+00> : vector<8x128xf32>
    %5 = tpu.matmul %3, %4, %cst {dimension_numbers = #tpu.dot_dimension_numbers<[1], [0], [0], [1], [0, 0, 1, 1], [], []>} : vector<8x128xf32>, vector<128x128xf32>, vector<8x128xf32> -> vector<8x128xf32>
    %c0_4 = arith.constant 0 : index
    %c0_5 = arith.constant 0 : index
    %6 = vector.load %arg4[%c0_4, %c0_5] : memref<1x128xf32, #tpu.memory_space<vmem>>, vector<1x128xf32>
    %7 = vector.broadcast %6 : vector<1x128xf32> to vector<8x128xf32>
    %8 = arith.addf %5, %7 : vector<8x128xf32>
    %cst_6 = arith.constant 5.000000e-01 : f32
    %9 = vector.broadcast %cst_6 : f32 to vector<8x128xf32>
    %10 = arith.mulf %9, %8 : vector<8x128xf32>
    %cst_7 = arith.constant 0.707106769 : f32
    %11 = vector.broadcast %cst_7 : f32 to vector<8x128xf32>
    %12 = arith.mulf %8, %11 : vector<8x128xf32>
    %13 = math.erf %12 : vector<8x128xf32>
    %cst_8 = arith.constant 1.000000e+00 : f32
    %14 = vector.broadcast %cst_8 : f32 to vector<8x128xf32>
    %15 = arith.addf %14, %13 : vector<8x128xf32>
    %16 = arith.mulf %10, %15 : vector<8x128xf32>
    %c0_9 = arith.constant 0 : index
    %c0_10 = arith.constant 0 : index
    %17 = vector.load %arg5[%c0_9, %c0_10] : memref<128x128xf32, #tpu.memory_space<vmem>>, vector<128x128xf32>
    %c0_11 = arith.constant 0 : index
    %c0_12 = arith.constant 0 : index
    %18 = vector.load %arg8[%c0_11, %c0_12] : memref<8x128xf32, #tpu.memory_space<vmem>>, vector<8x128xf32>
    %cst_13 = arith.constant dense<0.000000e+00> : vector<8x128xf32>
    %19 = tpu.matmul %16, %17, %cst_13 {dimension_numbers = #tpu.dot_dimension_numbers<[1], [0], [0], [1], [0, 0, 1, 1], [], []>} : vector<8x128xf32>, vector<128x128xf32>, vector<8x128xf32> -> vector<8x128xf32>
    %20 = arith.addf %18, %19 : vector<8x128xf32>
    %c0_14 = arith.constant 0 : index
    %c0_15 = arith.constant 0 : index
    %21 = vector.load %arg8[%c0_14, %c0_15] : memref<8x128xf32, #tpu.memory_space<vmem>>, vector<8x128xf32>
    tpu.vector_store %arg8[%c0_14, %c0_15], %20 {strides = array<i32>} : memref<8x128xf32, #tpu.memory_space<vmem>>, vector<8x128xf32>,
    %c0_i32_16 = arith.constant 0 : i32
    %22 = arith.cmpi eq, %arg1, %c0_i32_16 : i32
    %23 = arith.extui %22 : i1 to i32
    %c0_i32_17 = arith.constant 0 : i32
    %24 = arith.cmpi ne, %23, %c0_i32_17 : i32
    scf.if %24 {
      %c0_18 = arith.constant 0 : index
      %c0_19 = arith.constant 0 : index
      %25 = vector.load %arg8[%c0_18, %c0_19] : memref<8x128xf32, #tpu.memory_space<vmem>>, vector<8x128xf32>
      %c0_20 = arith.constant 0 : index
      %c0_21 = arith.constant 0 : index
      %26 = vector.load %arg7[%c0_20, %c0_21] : memref<8x128xf32, #tpu.memory_space<vmem>>, vector<8x128xf32>
      tpu.vector_store %arg7[%c0_20, %c0_21], %25 {strides = array<i32>} : memref<8x128xf32, #tpu.memory_space<vmem>>, vector<8x128xf32>,
    } else {
    }
    return
  }
  func.func @transform_0(%arg0: i32, %arg1: i32) -> (i32, i32) {
    %c0_i32 = arith.constant 0 : i32
    %c0_i32_0 = arith.constant 0 : i32
    return %arg0, %c0_i32 : i32, i32
  }
  func.func @transform_1(%arg0: i32, %arg1: i32) -> (i32, i32) {
    %c0_i32 = arith.constant 0 : i32
    %c0_i32_0 = arith.constant 0 : i32
    return %c0_i32, %arg1 : i32, i32
  }
  func.func @transform_2(%arg0: i32, %arg1: i32) -> (i32, i32) {
    %c0_i32 = arith.constant 0 : i32
    %c0_i32_0 = arith.constant 0 : i32
    return %c0_i32, %arg1 : i32, i32
  }
  func.func @transform_3(%arg0: i32, %arg1: i32) -> (i32, i32) {
    %c0_i32 = arith.constant 0 : i32
    %c0_i32_0 = arith.constant 0 : i32
    return %arg1, %c0_i32 : i32, i32
  }
  func.func @transform_4(%arg0: i32, %arg1: i32) -> (i32, i32) {
    %c0_i32 = arith.constant 0 : i32
    %c0_i32_0 = arith.constant 0 : i32
    %c0_i32_1 = arith.constant 0 : i32
    return %c0_i32, %c0_i32_0 : i32, i32
  }
  func.func @transform_5(%arg0: i32, %arg1: i32) -> (i32, i32) {
    %c0_i32 = arith.constant 0 : i32
    %c0_i32_0 = arith.constant 0 : i32
    return %arg0, %c0_i32 : i32, i32
  }
}

</mosaic_0001>

<bundles_post_ra>
// kernel: tpu_custom_call.1
= control target key start
LH: loop header
LB: loop body
LE: loop exit
PB: predicated region body
PF: predicated region fallthrough
CT: control target
= control target key end

     0   :  { %10 = vsyncpa [#allocation4], 0  ;;  %s1397_s0 = inlined_call_operand.hbm [shape: f32[16,128], index: 0, kind: input, shape index: {}]   ;;  %s1398_s1 = inlined_call_operand.hbm [shape: f32[128,128], index: 1, kind: input, shape index: {}]   ;;  %s1399_s2 = inlined_call_operand.vmem [shape: f32[1,128], index: 2, kind: input, shape index: {}]   ;;  %s1400_s3 = inlined_call_operand.hbm [shape: f32[128,128], index: 3, kind: input, shape index: {}]   ;;  %s1401_s4 = inlined_call_operand.vmem [shape: f32[1,128], index: 4, kind: input, shape index: {}]   ;;  %s1402_s5 = inlined_call_operand.hbm [shape: f32[16,128], index: 5, kind: output, shape index: {}]  }
   0x1   :  { %12 = vsyncpa [#allocation4 + $0x1], 0 }
   0x2   :  { %13 = vsyncpa [#allocation7], 0 }
   0x3   :  { %14 = vsyncpa [#allocation5], 0 }
   0x4   :  { %16 = vsyncpa [#allocation5 + $0x1], 0  ;;  %s1118_s18 = smov 0   ;;  %s1120_s19 = smov 0  }
   0x5   :  { %s1122_s20 = smov 0   ;;  %s1124_s21 = smov 0  }
   0x6   :  { %s1126_s22 = smov 0   ;;  %s1128_s23 = smov 0  }
   0x7 LB: > { %s643_s24 = sadd.s32 4294967295, %s1077_s23   ;;  %s644_s25 = sadd.s32 4294967294, %s1077_s23   ;;  %s1077_s23 = sphi %s1128_s23, %s22_s23   ;;  %s1073_s22 = sphi %s1126_s22, %s1424_s22   ;;  %s1069_s21 = sphi %s1124_s21, %s1423_s21   ;;  %s1065_s20 = sphi %s1122_s20, %s1422_s20   ;;  %s1061_s19 = sphi %s1120_s19, %s1421_s19   ;;  %s1057_s18 = sphi %s1118_s18, %s1420_s18  }
   0x8   : > { %p54_p0 = scmp.ne.s32.totalorder %s1061_s19, %s1057_s18  ;;  %p1152_p1 = scmp.eq.s32.totalorder %s643_s24, 0 }
   0x9   : > { %p1156_p2 = scmp.eq.s32.totalorder %s643_s24, 1  ;;  %p183_p3 = scmp.eq.s32.totalorder %s644_s25, 1 }
   0xa   : > { %s1407_s26 = scalar_select %p1152_p1, 1, 0 }
   0xb   : > { %p1162_p4 = por %p1152_p1, %p54_p0  ;;  %p645_p5 = scmp.ge.s32.totalorder %s1077_s23, 1 }
   0xc   : > { %p1167_p6 = por %p183_p3, %p54_p0  ;;  %p190_p7 = scmp.lt.s32.totalorder %s1077_s23, 3 }
   0xd   : > { %s1409_s28 = scalar_select %p1162_p4, 1, 0 }
   0xe   : > { %s1410_s29 = scalar_select %p1167_p6, 1, 0 }
   0xf   : > { %p1172_p8 = pnand %p645_p5, %p190_p7  ;;  %s1079_s6 = smov [#allocation6]  }
  0x10   : > { %s204_s7 = sshll.u32 %s1079_s6, 4  ;;  %s1080_s9 = smov [#allocation8]   ;;  %s1176_s7 = int_to_ptr.vmem [resolvable:$true] %s204_s7 }
  0x11   : > { %p827_p9 = pneg %p1172_p8  ;;  %s226_s10 = sshll.u32 %s1080_s9, 4  ;;  %s1187_s10 = int_to_ptr.vmem [resolvable:$true] %s226_s10 }
  0x12   : > { %s905_s13 = scalar_lea.hbm %s1398_s1, 2048 }
  0x13   : > { %p1183_p11 = pnand %p827_p9, %p1152_p1  ;;  %p906_p12 = scmp.ne.s32.totalorder %s1398_s1, %s905_s13 }
  0x14   : > { %p912_p5 = scmp.lt.u32.totalorder %s905_s13, %s1398_s1 }
  0x15   : > { %p907_p13 = pneg %p1183_p11 }
  0x17   : > { %p908_p0 = pnand %p907_p13, %p906_p12 }
  0x19   : > { %p909_p3 = pneg %p908_p0 }
  0x1b   : > { %p914_p7 = pnand %p912_p5, %p909_p3 }
  0x1d   : > { %917 = shalt.err (!%p914_p7)
}
  0x1e   : > { %s918_s24 = scalar_lea.vmem %s1176_s7, 2048  ;;  %p926_p1 = scmp.lt.s32.totalorder %s1176_s7, %s1176_s7 }
  0x1f   : > { %p919_p9 = scmp.ne.s32.totalorder %s1176_s7, %s918_s24  ;;  %p927_p12 = scmp.lt.s32.totalorder %s918_s24, %s918_s24 }
  0x21   : > { %p921_p10 = pnand %p919_p9, %p907_p13  ;;  %p928_p0 = por %p927_p12, %p926_p1 }
  0x23   : > { %p922_p6 = pneg %p921_p10 }
  0x25   : > { %p929_p4 = pnand %p928_p0, %p922_p6 }
  0x27   : > { %932 = shalt.err (!%p929_p4)
}
  0x28   : > { %s1081_s25 = smov 128   ;;  %s1082_s6 = smov 8  }
  0x29   : > { %830 = dma.hbm_to_vmem [thread:$0]  (!%p1183_p11), %s1398_s1, 2048, %s1176_s7, [#allocation7], %s1081_s25, %s1081_s25, %s1082_s6  }
  0x2a   : > { %s933_s14 = scalar_lea.hbm %s1400_s3, 2048 }
  0x2b   : > { %p934_p1 = scmp.ne.s32.totalorder %s1400_s3, %s933_s14  ;;  %p940_p10 = scmp.lt.u32.totalorder %s933_s14, %s1400_s3 }
  0x2d   : > { %p936_p4 = pnand %p934_p1, %p907_p13 }
  0x2f   : > { %p937_p6 = pneg %p936_p4 }
  0x31   : > { %p942_p3 = pnand %p940_p10, %p937_p6 }
  0x33   : > { %945 = shalt.err (!%p942_p3)
}
  0x34   : > { %s946_s7 = scalar_lea.vmem %s1187_s10, 2048  ;;  %p954_p12 = scmp.lt.s32.totalorder %s1187_s10, %s1187_s10 }
  0x35   : > { %p947_p5 = scmp.ne.s32.totalorder %s1187_s10, %s946_s7  ;;  %p955_p0 = scmp.lt.s32.totalorder %s946_s7, %s946_s7 }
  0x37   : > { %p949_p7 = pnand %p947_p5, %p907_p13  ;;  %p956_p1 = por %p955_p0, %p954_p12 }
  0x39   : > { %p950_p9 = pneg %p949_p7 }
  0x3b   : > { %p957_p4 = pnand %p956_p1, %p950_p9 }
  0x3d   : > { %960 = shalt.err (!%p957_p4)
}
  0x3e   : > { %833 = dma.hbm_to_vmem [thread:$0]  (!%p1183_p11), %s1400_s3, 2048, %s1187_s10, [#allocation7], %s1081_s25, %s1081_s25, %s1082_s6  }
  0x3f   : > { %s34_s12 = sadd.s32 1, %s1073_s22  ;;  %s41_s13 = sadd.s32 1, %s1065_s20 }
  0x40   : > { %p36_p13 = scmp.ge.s32.totalorder %s34_s12, 2  ;;  %p48_p6 = scmp.ne.s32.totalorder %s1065_s20, %s1061_s19 }
  0x41   : > { %p49_p10 = scmp.eq.s32.totalorder %s1077_s23, 0  ;;  %p844_p3 = scmp.lt.s32.totalorder %s1077_s23, 2 }
  0x42   : > { %s1426_s12 = smov (%p36_p13, %s34_s12), 0  ;;  %p1251_p7 = por %p1156_p2, %p48_p6 }
  0x43   : > { %p50_p5 = por %p49_p10, %p48_p6  ;;  %s38_s14 = ssub.s32 %s1073_s22, %s1426_s12 }
  0x44   : > { %s1413_s8 = scalar_select %p1251_p7, 1, 0 }
  0x45   : > { %s243_s15 = sand.u32 1, %s1065_s20   ;;  %p39_p9 = scmp.eq.s32.totalorder %s38_s14, 0 }
  0x46   : > { %s650_s10 = sshll.u32 %s243_s15, 3  ;;  %s651_s25 = sshll.u32 %s1073_s22, 7 }
  0x47   : > { %s1260_s6 = scalar_select %p39_p9, %s1065_s20, %s41_s13  }
  0x48   : > { %s1265_s24 = scalar_lea.hbm %s1397_s0, %s651_s25  ;;  %s247_s27 = scalar_lea.vmem [#allocation3], %s650_s10 }
  0x49   : > { %s254_s7 = sshll.u32 %s247_s27, 4  ;;  %p1269_p2 = pnand %p844_p3, %p50_p5  ;;  %s1273_s7 = int_to_ptr.vmem [resolvable:$true] %s254_s7 }
  0x4a   : > { %s244_s11 = scalar_lea.sflag [#allocation4], %s243_s15  ;;  %s961_s13 = scalar_lea.hbm %s1265_s24, 128 }
  0x4b   : > { %p962_p11 = scmp.ne.s32.totalorder %s1265_s24, %s961_s13  ;;  %p963_p12 = pneg %p1269_p2 }
  0x4c   : > { %s966_s25 = scalar_lea.hbm %s1397_s0, 256  ;;  %p967_p4 = scmp.lt.u32.totalorder %s1265_s24, %s1397_s0 }
  0x4d   : > { %p964_p0 = pnand %p963_p12, %p962_p11  ;;  %p968_p13 = scmp.lt.u32.totalorder %s966_s25, %s961_s13 }
  0x4e   : > { %p970_p10 = scmp.lt.u32.totalorder %s961_s13, %s1265_s24 }
  0x4f   : > { %p965_p1 = pneg %p964_p0  ;;  %p969_p6 = por %p968_p13, %p967_p4 }
  0x51   : > { %p971_p3 = por %p970_p10, %p969_p6 }
  0x53   : > { %p972_p5 = pnand %p971_p3, %p965_p1 }
  0x55   : > { %975 = shalt.err (!%p972_p5)
}
  0x56   : > { %s976_s15 = scalar_lea.vmem %s1273_s7, 128  ;;  %s1083_s27 = smov [#allocation3]  }
  0x57   : > { %p977_p9 = scmp.ne.s32.totalorder %s1273_s7, %s976_s15  ;;  %s981_s14 = sshll.u32 %s1083_s27, 4  ;;  %s982_s14 = int_to_ptr.vmem [resolvable:$false] %s981_s14 }
  0x58   : > { %s983_s10 = scalar_lea.vmem %s982_s14, 256  ;;  %p984_p7 = scmp.lt.s32.totalorder %s1273_s7, %s982_s14 }
  0x59   : > { %p979_p11 = pnand %p977_p9, %p963_p12  ;;  %p985_p4 = scmp.lt.s32.totalorder %s983_s10, %s976_s15 }
  0x5b   : > { %p980_p0 = pneg %p979_p11  ;;  %p986_p13 = por %p985_p4, %p984_p7 }
  0x5d   : > { %p987_p6 = pnand %p986_p13, %p980_p0 }
  0x5f   : > { %990 = shalt.err (!%p987_p6)
}
  0x60   : > { %837 = dma.hbm_to_vmem [thread:$0]  (!%p1269_p2), %s1265_s24, 128, %s1273_s7, %s244_s11  }
  0x61   : > { %263 = sbr.rel (%p1172_p8) target bundleno = 602 (0x25a), region = 40  ;;  %s1303_s13 = sand.u32 (!%p1172_p8), 1, %s1061_s19  }
  0x62   : > { %s653_s25 = sshll.u32 (!%p1172_p8), %s1303_s13, 3  ;;  %s266_s16 = scalar_lea.sflag (!%p1172_p8), [#allocation4], %s1303_s13 }
  0x63   : > { %s1309_s17 = scalar_lea.vmem (!%p1172_p8), [#allocation3], %s653_s25  ;;  %p1415_p7 = scmp.ne.s32.totalorder (!%p1172_p8), %s1409_s28, 0 }
  0x68   : > { %1044 = dma.done.wait (%p1415_p7), %s266_s16, 128  }
  0x69   : > { %1046 = vsyncadd (%p1415_p7), %s266_s16, 4294967168  ;;  %p1416_p2 = scmp.ne.s32.totalorder %s1407_s26, 0 }
  0x6b   : > { %1048 = dma.done.wait (%p1416_p2), [#allocation7], 4096  }
  0x6c   : > { %1050 = vsyncadd (%p1416_p2), [#allocation7], 4294963200  ;;  %v1084_v0 = vmov 0.0|0.0   ;;  %vm1085_vm0 = vmmov 0   ;;  %v1086_v1 = vmov 0.0   ;;  %v324_v2 = vld [vmem:[#allocation6] sm:$0xff] }
  0x6d   : > { %767 = vmatprep.subr.bf16.mxu0 %v1084_v0  ;;  %729 = vmatprep.mubr.msk.f32.mxu0 %vm1085_vm0, %v1086_v1  ;;  %v325_v3 = vld [vmem:[#allocation6 + $0x8] sm:$0xff]  ;;  %v326_v4 = vld [vmem:[#allocation6 + $0x10] sm:$0xff]  ;;  %v327_v6 = vld [vmem:[#allocation6 + $0x18] sm:$0xff]  ;;  %s660_s7 = sshll.u32 %s1069_s21, 7  ;;  %s306_s9 = scalar_lea.vmem [#allocation9], %s653_s25 }
  0x6e   : > { %791 = vmatprep.subr.bf16.mxu1 %v1084_v0  ;;  %764 = vmatprep.mubr.msk.f32.mxu1 %vm1085_vm0, %v1086_v1  ;;  %v768_v5 = vpack.c.bf16 %v325_v3, %v324_v2  ;;  %v771_v7 = vpack.c.bf16 %v327_v6, %v326_v4  ;;  %v328_v8 = vld [vmem:[#allocation6 + $0x20] sm:$0xff]  ;;  %v329_v9 = vld [vmem:[#allocation6 + $0x28] sm:$0xff]  ;;  %v424_v12 = vld [vmem:[#allocation8 + $0x10] sm:$0xff]  ;;  %s530_s11 = sshll.u32 %s306_s9, 4  ;;  %s1348_s14 = scalar_lea.hbm %s1402_s5, %s660_s7  ;;  %s1350_s11 = int_to_ptr.vmem [resolvable:$true] %s530_s11 }
  0x6f   : > { %v422_v10 = vld [vmem:[#allocation8] sm:$0xff]  ;;  %v423_v11 = vld [vmem:[#allocation8 + $0x8] sm:$0xff]  ;;  %v425_v13 = vld [vmem:[#allocation8 + $0x18] sm:$0xff]  ;;  %v774_v14 = vpack.c.bf16 %v329_v9, %v328_v8  ;;  %s517_s10 = scalar_lea.sflag [#allocation5], %s1303_s13  ;;  %s991_s16 = scalar_lea.vmem %s1350_s11, 128 }
  0x70   : > { %769 = vmatpush3.bf16.msra.mxu0 %v768_v5  ;;  %v792_v15 = vpack.c.bf16 %v423_v11, %v422_v10  ;;  %v330_v16 = vld [vmem:[#allocation6 + $0x30] sm:$0xff]  ;;  %v331_v17 = vld [vmem:[#allocation6 + $0x38] sm:$0xff]  ;;  %v795_v18 = vpack.c.bf16 %v425_v13, %v424_v12  ;;  %v426_v19 = vld [vmem:[#allocation8 + $0x20] sm:$0xff]  ;;  %p992_p8 = scmp.ne.s32.totalorder %s1350_s11, %s991_s16  ;;  %p1417_p12 = scmp.ne.s32.totalorder %s1413_s8, 0 }
  0x71   : > { %770 = vmatprep.subr.bf16.mxu0 %v1084_v0  ;;  %v427_v20 = vld [vmem:[#allocation8 + $0x28] sm:$0xff]  ;;  %v777_v21 = vpack.c.bf16 %v331_v17, %v330_v16  ;;  %v332_v22 = vld [vmem:[#allocation6 + $0x40] sm:$0xff]  ;;  %v334_v26 = vld [vmem:[#allocation6 + $0x50] sm:$0xff]  ;;  %s1087_s21 = smov [#allocation9]  }
  0x72   : > { %793 = vmatpush3.bf16.msra.mxu1 %v792_v15  ;;  %v333_v23 = vld [vmem:[#allocation6 + $0x48] sm:$0xff]  ;;  %v798_v24 = vpack.c.bf16 %v427_v20, %v426_v19  ;;  %v335_v27 = vld [vmem:[#allocation6 + $0x58] sm:$0xff]  ;;  %v336_v29 = vld [vmem:[#allocation6 + $0x60] sm:$0xff]  ;;  %p993_p1 = pnand %p992_p8, %p1417_p12  ;;  %s995_s25 = sshll.u32 %s1087_s21, 4  ;;  %s996_s25 = int_to_ptr.vmem [resolvable:$false] %s995_s25 }
  0x73   : > { %794 = vmatprep.subr.bf16.mxu1 %v1084_v0  ;;  %v780_v25 = vpack.c.bf16 %v333_v23, %v332_v22  ;;  %v783_v28 = vpack.c.bf16 %v335_v27, %v334_v26  ;;  %v337_v30 = vld [vmem:[#allocation6 + $0x68] sm:$0xff]  ;;  %v338_v32 = vld [vmem:[#allocation6 + $0x70] sm:$0xff]  ;;  %v339_v33 = vld [vmem:[#allocation6 + $0x78] sm:$0xff]  ;;  %p998_p3 = scmp.lt.s32.totalorder %s1350_s11, %s996_s25 }
  0x74   : > { %772 = vmatpush3.bf16.msra.mxu0 %v771_v7  ;;  %v786_v31 = vpack.c.bf16 %v337_v30, %v336_v29  ;;  %v789_v34 = vpack.c.bf16 %v339_v33, %v338_v32  ;;  %v323_v35 = vld [vmem:[%s1309_s17] sm:$0xff]  ;;  %v430_v39 = vld [vmem:[#allocation8 + $0x40] sm:$0xff]  ;;  %v431_v40 = vld [vmem:[#allocation8 + $0x48] sm:$0xff]  ;;  %p994_p10 = pneg %p993_p1  ;;  %s997_s17 = scalar_lea.vmem %s996_s25, 256 }
  0x75   : > { %773 = vmatprep.subr.bf16.mxu0 %v1084_v0  ;;  %v428_v36 = vld [vmem:[#allocation8 + $0x30] sm:$0xff]  ;;  %v429_v37 = vld [vmem:[#allocation8 + $0x38] sm:$0xff]  ;;  %v804_v41 = vpack.c.bf16 %v431_v40, %v430_v39  ;;  %v434_v45 = vld [vmem:[#allocation8 + $0x60] sm:$0xff]  ;;  %p999_p5 = scmp.lt.s32.totalorder %s997_s17, %s991_s16 }
  0x76   : > { %796 = vmatpush3.bf16.msra.mxu1 %v795_v18  ;;  %v801_v38 = vpack.c.bf16 %v429_v37, %v428_v36  ;;  %v432_v42 = vld [vmem:[#allocation8 + $0x50] sm:$0xff]  ;;  %v433_v43 = vld [vmem:[#allocation8 + $0x58] sm:$0xff]  ;;  %v435_v46 = vld [vmem:[#allocation8 + $0x68] sm:$0xff] }
  0x77   : > { %797 = vmatprep.subr.bf16.mxu1 %v1084_v0  ;;  %v807_v44 = vpack.c.bf16 %v433_v43, %v432_v42  ;;  %v810_v47 = vpack.c.bf16 %v435_v46, %v434_v45  ;;  %v436_v48 = vld [vmem:[#allocation8 + $0x70] sm:$0xff]  ;;  %v437_v49 = vld [vmem:[#allocation8 + $0x78] sm:$0xff]  ;;  %p1000_p9 = por %p999_p5, %p998_p3 }
  0x78   : > { %775 = vmatpush3.bf16.msra.mxu0 %v774_v14  ;;  %v813_v50 = vpack.c.bf16 %v437_v49, %v436_v48  ;;  %v658_v51 = vld [vmem:[%s1399_s2] ss:$0 sm:$0xff] }
  0x79   : > { %776 = vmatprep.subr.bf16.mxu0 %v1084_v0  ;;  %v657_v60 = vld [vmem:[%s1401_s4] ss:$0 sm:$0xff]  ;;  %p1001_p11 = pnand %p1000_p9, %p994_p10 }
  0x7a   : > { %799 = vmatpush3.bf16.msra.mxu1 %v798_v24 }
  0x7b   : > { %800 = vmatprep.subr.bf16.mxu1 %v1084_v0 }
  0x7c   : > { %778 = vmatpush3.bf16.msra.mxu0 %v777_v21 }
  0x7d   : > { %779 = vmatprep.subr.bf16.mxu0 %v1084_v0 }
  0x7e   : > { %802 = vmatpush3.bf16.msra.mxu1 %v801_v38 }
  0x7f   : > { %803 = vmatprep.subr.bf16.mxu1 %v1084_v0 }
  0x80   : > { %781 = vmatpush3.bf16.msra.mxu0 %v780_v25 }
  0x81   : > { %782 = vmatprep.subr.bf16.mxu0 %v1084_v0 }
  0x82   : > { %805 = vmatpush3.bf16.msra.mxu1 %v804_v41 }
  0x83   : > { %806 = vmatprep.subr.bf16.mxu1 %v1084_v0 }
  0x84   : > { %784 = vmatpush3.bf16.msra.mxu0 %v783_v28 }
  0x85   : > { %785 = vmatprep.subr.bf16.mxu0 %v1084_v0 }
  0x86   : > { %808 = vmatpush3.bf16.msra.mxu1 %v807_v44 }
  0x87   : > { %809 = vmatprep.subr.bf16.mxu1 %v1084_v0 }
  0x88   : > { %787 = vmatpush3.bf16.msra.mxu0 %v786_v31 }
  0x89   : > { %788 = vmatprep.subr.bf16.mxu0 %v1084_v0 }
  0x8a   : > { %811 = vmatpush3.bf16.msra.mxu1 %v810_v47 }
  0x8b   : > { %812 = vmatprep.subr.bf16.mxu1 %v1084_v0 }
  0x8c   : > { %790 = vmatpush3.bf16.msra.mxu0 %v789_v34 }
  0x8e   : > { %814 = vmatpush3.bf16.msra.mxu1 %v813_v50 }
  0x8f   : > { %730 = vmatmul.mubr.f32.vlgmr.msra.gmra.mrb[0].mxu0 %v323_v35 }
 0x162   : > { %v413_v52 = vpop.f32.mrb[0].mxu0 }
 0x163   : > { %v414_v53 = vadd.f32 %v658_v51, %v413_v52  ;;  %v731_v54 = vpop.f32.mrb[1].mxu0 }
 0x165   : > { %v418_v55 = vmul.f32 0.70710677, %v414_v53  ;;  %v417_v57 = vmul.f32 0.5, %v414_v53 }
 0x167   : > { %903 = verf.f32 %v418_v55 }
 0x171   : > { %v904_v56 = vpop.eup %903 }
 0x172   : > { %v420_v58 = vadd.f32 1.0, %v904_v56 }
 0x174   : > { %v421_v59 = vmul.f32 %v420_v58, %v417_v57 }
 0x176   : > { %765 = vmatmul.mubr.f32.vlgmr.msra.gmra.mrb[0].mxu1 %v421_v59 }
 0x249   : > { %v505_v61 = vpop.f32.mrb[0].mxu1 }
 0x24a   : > { %v509_v62 = vadd.f32 %v657_v60, %v505_v61  ;;  %v766_v63 = vpop.f32.mrb[1].mxu1 }
 0x24c   : > { %515 = vst [vmem:[%s306_s9] sm:$0xff] %v509_v62 }
 0x24d   : > { %1004 = shalt.err (!%p1001_p11)
}
 0x24e   : > { %s1005_s13 = scalar_lea.hbm %s1348_s14, 128  ;;  %s1009_s30 = scalar_lea.hbm %s1402_s5, 256 }
 0x24f   : > { %p1006_p0 = scmp.ne.s32.totalorder %s1348_s14, %s1005_s13  ;;  %p1010_p6 = scmp.lt.u32.totalorder %s1348_s14, %s1402_s5 }
 0x250   : > { %p1011_p7 = scmp.lt.u32.totalorder %s1009_s30, %s1005_s13  ;;  %p1013_p8 = scmp.lt.u32.totalorder %s1005_s13, %s1348_s14 }
 0x251   : > { %p1007_p4 = pnand %p1006_p0, %p1417_p12 }
 0x252   : > { %p1012_p2 = por %p1011_p7, %p1010_p6 }
 0x253   : > { %p1008_p13 = pneg %p1007_p4 }
 0x254   : > { %p1014_p1 = por %p1013_p8, %p1012_p2 }
 0x256   : > { %p1015_p10 = pnand %p1014_p1, %p1008_p13 }
 0x258   : > { %1018 = shalt.err (!%p1015_p10)
}
 0x259   : > { %825 = dma.vmem_to_hbm [thread:$0]  (%p1417_p12), %s1350_s11, 128, %s1348_s14, %s517_s10  }
 0x25a PF: > { %s542_s9 = sand.u32 1, %s1057_s18   ;;  %p1418_p3 = scmp.ne.s32.totalorder %s1410_s29, 0 }
 0x25b   : > { %p1419_p5 = scmp.ge.s32.totalorder %s1077_s23, 2  ;;  %s543_s15 = scalar_lea.sflag [#allocation5], %s542_s9 }
 0x25d   : > { %p839_p9 = pnand %p1419_p5, %p1418_p3 }
 0x25f   : > { %1052 = dma.done.wait (!%p839_p9), %s543_s15, 128  }
 0x260   : > { %1054 = vsyncadd (!%p839_p9), %s543_s15, 4294967168  ;;  %s22_s23 = sadd.s32 1, %s1077_s23   ;;  %s1420_s18 = smov %s1061_s19 }
 0x261   : > { %p19_p11 = scmp.ge.s32.totalorder %s22_s23, 4   ;;  %s1421_s19 = smov %s1065_s20 }
 0x262   : > { %s1422_s20 = smov %s1260_s6  ;;  %s1423_s21 = smov %s1073_s22 }
 0x263   : > { %s1424_s22 = smov %s1426_s12  ;;  %21 = sbr.rel (!%p19_p11) target bundleno = 7 (0x7), region = 106 }
 0x26a   :  { %548 = vsyncpa [#allocation4], 1 }
 0x26b   :  { %550 = vsyncpa [#allocation4 + $0x1], 1 }
 0x26c   :  { %551 = vsyncpa [#allocation7], 1 }
 0x26d   :  { %552 = vsyncpa [#allocation5], 1 }
 0x26e   :  { %554 = vsyncpa [#allocation5 + $0x1], 1 }

</bundles_post_ra>
